<compile_context>
chip_gen: v6e
topology: v6e:2x2x1
jax: 0.10.0
libtpu: 0.0.40
codegen_flags: <defaults>
</compile_context>

<pallas_src>
import functools
import numpy as np
import jax
import jax.numpy as jnp
from jax import lax
from jax.experimental import pallas as pl
from jax.experimental.pallas import tpu as pltpu


def _conv3x3_bn_relu(a, w_ref, shift_ref, masks_ref, pbuf_ref, col_ref, Wh, Wp):
    """3x3 conv (padding=1) + folded-BN shift + ReLU on a flattened (C, HW) slab.

    a         : (C, HW) f32 activations, HW = Hh*Wh flattened row-major.
    w_ref     : (Cout, 9*C) weights, tap-major (k = 3*(dy+1) + (dx+1)).
    shift_ref : (Cout, 1) per-channel shift (conv bias + BN folded).
    masks_ref : (9, 1, HW) f32 tap-validity masks (zero outside the image).
    pbuf_ref  : (C, HW + 2*Wp) f32 scratch, Wp = Wh + 1 halo on each side.
    col_ref   : (9*C, HW) f32 scratch holding the im2col slab.
    """
    C, HW = a.shape
    # Zero-padded copy of the activations (halo of Wp lanes on both sides).
    pbuf_ref[...] = jnp.zeros_like(pbuf_ref)
    pbuf_ref[:, Wp:Wp + HW] = a
    # Build the im2col slab: 9 statically shifted slices, masked at the borders.
    k = 0
    for dy in (-1, 0, 1):
        for dx in (-1, 0, 1):
            s = dy * Wh + dx                              # flat shift of tap k
            tap = pbuf_ref[:, Wp + s:Wp + s + HW]         # (C, HW)
            col_ref[k * C:(k + 1) * C, :] = tap * masks_ref[k]
            k += 1
    # One fused MXU matmul per conv (bf16 or f32 inputs, f32 accumulation).
    w = w_ref[...]
    col = col_ref[...].astype(w.dtype)
    y = jnp.dot(w, col, preferred_element_type=jnp.float32)   # (Cout, HW)
    return jnp.maximum(y + shift_ref[...], 0.0)


def _down_kernel(x_ref, masks_ref, w1_ref, sh1_ref, w2_ref, sh2_ref, o_ref,
                 pbuf1, col1, pbuf2, col2, *, Wh, Wp):
    # x_ref: (1, 4, Cin, HW) -- axis 1 enumerates the 2x2 max-pool window.
    x = x_ref[0]                                   # (4, Cin, HW)
    p = jnp.max(x, axis=0)                         # 2x2 max-pool -> (Cin, HW)
    y1 = _conv3x3_bn_relu(p, w1_ref, sh1_ref, masks_ref, pbuf1, col1, Wh, Wp)
    y2 = _conv3x3_bn_relu(y1, w2_ref, sh2_ref, masks_ref, pbuf2, col2, Wh, Wp)
    o_ref[0] = y2.astype(o_ref.dtype)


def _tap_masks(Hh, Wh):
    """(9, 1, Hh*Wh) f32 masks: 1 where the (dy,dx)-shifted pixel is in-bounds."""
    ii, jj = np.meshgrid(np.arange(Hh), np.arange(Wh), indexing="ij")
    masks = []
    for dy in (-1, 0, 1):
        for dx in (-1, 0, 1):
            valid = ((ii + dy >= 0) & (ii + dy < Hh) &
                     (jj + dx >= 0) & (jj + dx < Wh))
            masks.append(valid.reshape(1, Hh * Wh))
    return jnp.asarray(np.stack(masks, 0).astype(np.float32))


def down_forward(x_nchw, params, *, compute_dtype=jnp.bfloat16):
    N, Cin, H, W = x_nchw.shape
    Hh, Wh = H // 2, W // 2                 # MaxPool2d(2) floors odd sizes
    x_nchw = x_nchw[:, :, :2 * Hh, :2 * Wh]
    hw = Hh * Wh
    Wp = Wh + 1
    eps = 1e-5

    Cmid = params["w1"].shape[0]
    Cout = params["w2"].shape[0]

    # Fold conv bias + inference-mode BatchNorm: scale into weights, shift kept.
    scale1 = params["gamma1"] / jnp.sqrt(params["var1"] + eps)
    shift1 = params["beta1"] + (params["b1"] - params["mean1"]) * scale1
    scale2 = params["gamma2"] / jnp.sqrt(params["var2"] + eps)
    shift2 = params["beta2"] + (params["b2"] - params["mean2"]) * scale2
    w1 = params["w1"] * scale1[:, None, None, None]     # (Cmid, Cin, 3, 3)
    w2 = params["w2"] * scale2[:, None, None, None]     # (Cout, Cmid, 3, 3)

    # Torch (O, I, kh, kw) -> (O, 9*I), tap-major: flat idx = (3*ky+kx)*I + i.
    w1f = jnp.transpose(w1, (0, 2, 3, 1)).reshape(Cmid, 9 * Cin).astype(compute_dtype)
    w2f = jnp.transpose(w2, (0, 2, 3, 1)).reshape(Cout, 9 * Cmid).astype(compute_dtype)

    # NCHW -> (N, 4, Cin, HW): axis 1 enumerates the 2x2 pool window, spatial
    # positions are flattened row-major onto the lane dim.
    xw = x_nchw.reshape(N, Cin, Hh, 2, Wh, 2)
    xw = jnp.transpose(xw, (0, 3, 5, 1, 2, 4)).reshape(N, 4, Cin, hw)

    masks = _tap_masks(Hh, Wh)                           # (9, 1, hw) f32

    kernel = functools.partial(_down_kernel, Wh=Wh, Wp=Wp)
    out = pl.pallas_call(
        kernel,
        out_shape=jax.ShapeDtypeStruct((N, Cout, hw), jnp.float32),
        grid=(N,),
        in_specs=[
            pl.BlockSpec((1, 4, Cin, hw), lambda n: (n, 0, 0, 0)),
            pl.BlockSpec((9, 1, hw), lambda n: (0, 0, 0)),
            pl.BlockSpec((Cmid, 9 * Cin), lambda n: (0, 0)),
            pl.BlockSpec((Cmid, 1), lambda n: (0, 0)),
            pl.BlockSpec((Cout, 9 * Cmid), lambda n: (0, 0)),
            pl.BlockSpec((Cout, 1), lambda n: (0, 0)),
        ],
        out_specs=pl.BlockSpec((1, Cout, hw), lambda n: (n, 0, 0)),
        scratch_shapes=[
            pltpu.VMEM((Cin, hw + 2 * Wp), jnp.float32),
            pltpu.VMEM((9 * Cin, hw), jnp.float32),
            pltpu.VMEM((Cmid, hw + 2 * Wp), jnp.float32),
            pltpu.VMEM((9 * Cmid, hw), jnp.float32),
        ],
        compiler_params=pltpu.CompilerParams(
            dimension_semantics=("parallel",)),
    )(xw, masks, w1f, shift1.reshape(Cmid, 1), w2f, shift2.reshape(Cout, 1))

    return out.reshape(N, Cout, Hh, Wh)                  # already NCHW


def ref_down(x, params):
    """Pure-JAX reference mirroring the PyTorch module (eval-mode BN)."""
    eps = 1e-5
    p = lax.reduce_window(x, -jnp.inf, lax.max,
                          (1, 1, 2, 2), (1, 1, 2, 2), "VALID")

    def conv_bn_relu(h, w, b, gamma, beta, mean, var):
        y = lax.conv_general_dilated(
            h, w, window_strides=(1, 1), padding=((1, 1), (1, 1)),
            dimension_numbers=("NCHW", "OIHW", "NCHW"))
        y = y + b[None, :, None, None]
        y = (y - mean[None, :, None, None]) / jnp.sqrt(var[None, :, None, None] + eps)
        y = y * gamma[None, :, None, None] + beta[None, :, None, None]
        return jnp.maximum(y, 0.0)

    y = conv_bn_relu(p, params["w1"], params["b1"], params["gamma1"],
                     params["beta1"], params["mean1"], params["var1"])
    y = conv_bn_relu(y, params["w2"], params["b2"], params["gamma2"],
                     params["beta2"], params["mean2"], params["var2"])
    return y


if __name__ == "__main__":
    key = jax.random.PRNGKey(0)
    N, Cin, H, W = 2, 4, 16, 16
    Cout = 8
    Cmid = Cout  # DoubleConv: mid_channels defaults to out_channels
    ks = jax.random.split(key, 5)

    x = jax.random.normal(ks[0], (N, Cin, H, W), jnp.float32)
    params = dict(
        w1=jax.random.normal(ks[1], (Cmid, Cin, 3, 3), jnp.float32) * 0.2,
        b1=jax.random.normal(ks[2], (Cmid,), jnp.float32) * 0.1,
        gamma1=1.0 + 0.1 * jnp.arange(Cmid, dtype=jnp.float32),
        beta1=0.05 * jnp.arange(Cmid, dtype=jnp.float32),
        mean1=0.02 * jnp.arange(Cmid, dtype=jnp.float32),
        var1=1.0 + 0.05 * jnp.arange(Cmid, dtype=jnp.float32),
        w2=jax.random.normal(ks[3], (Cout, Cmid, 3, 3), jnp.float32) * 0.2,
        b2=jax.random.normal(ks[4], (Cout,), jnp.float32) * 0.1,
        gamma2=1.0 - 0.05 * jnp.arange(Cout, dtype=jnp.float32),
        beta2=-0.03 * jnp.arange(Cout, dtype=jnp.float32),
        mean2=0.01 * jnp.arange(Cout, dtype=jnp.float32),
        var2=1.0 + 0.1 * jnp.arange(Cout, dtype=jnp.float32),
    )

    ref = jax.block_until_ready(ref_down(x, params))

    # f32 MXU path: tight check against the XLA reference.
    out_f32 = jax.block_until_ready(
        down_forward(x, params, compute_dtype=jnp.float32))
    assert out_f32.shape == (N, Cout, H // 2, W // 2), out_f32.shape
    np.testing.assert_allclose(np.asarray(out_f32), np.asarray(ref),
                               rtol=5e-3, atol=5e-3)

    # bf16 MXU path (default, v6e/v7x fast path): loose check.
    out_bf16 = jax.block_until_ready(
        down_forward(x, params, compute_dtype=jnp.bfloat16))
    assert out_bf16.shape == (N, Cout, H // 2, W // 2), out_bf16.shape
    np.testing.assert_allclose(np.asarray(out_bf16), np.asarray(ref),
                               rtol=1e-1, atol=1e-1)

    print("KERNEL_OK")
</pallas_src>

<mosaic_0001>
module attributes {stable_mosaic.version = 11 : i64} {
  func.func @_down_kernel(%arg0: i32, %arg1: memref<1x4x4x64xf32, #tpu.memory_space<vmem>>, %arg2: memref<9x1x64xf32, #tpu.memory_space<vmem>>, %arg3: memref<8x36xf32, #tpu.memory_space<vmem>>, %arg4: memref<8x1xf32, #tpu.memory_space<vmem>>, %arg5: memref<8x72xf32, #tpu.memory_space<vmem>>, %arg6: memref<8x1xf32, #tpu.memory_space<vmem>>, %arg7: memref<1x8x64xf32, #tpu.memory_space<vmem>>, %arg8: memref<4x82xf32, #tpu.memory_space<vmem>>, %arg9: memref<36x64xf32, #tpu.memory_space<vmem>>, %arg10: memref<8x82xf32, #tpu.memory_space<vmem>>, %arg11: memref<72x64xf32, #tpu.memory_space<vmem>>) attributes {dimension_semantics = [#tpu.dimension_semantics<parallel>], iteration_bounds = array<i64: 2>, scalar_prefetch = 0 : i64, scratch_operands = 4 : i64, tpu.core_type = #tpu.core_type<tc>, window_params = [{transform_indices = @transform_0, window_bounds = array<i64: 1, 4, 4, 64>}, {pipeline_mode = #tpu.pipeline_mode<synchronous>, transform_indices = @transform_1, window_bounds = array<i64: 9, 1, 64>}, {pipeline_mode = #tpu.pipeline_mode<synchronous>, transform_indices = @transform_2, window_bounds = array<i64: 8, 36>}, {pipeline_mode = #tpu.pipeline_mode<synchronous>, transform_indices = @transform_3, window_bounds = array<i64: 8, 1>}, {pipeline_mode = #tpu.pipeline_mode<synchronous>, transform_indices = @transform_4, window_bounds = array<i64: 8, 72>}, {pipeline_mode = #tpu.pipeline_mode<synchronous>, transform_indices = @transform_5, window_bounds = array<i64: 8, 1>}, {transform_indices = @transform_6, window_bounds = array<i64: 1, 8, 64>}]} {
    %c0 = arith.constant 0 : index
    %c0_0 = arith.constant 0 : index
    %c0_1 = arith.constant 0 : index
    %c0_2 = arith.constant 0 : index
    %0 = vector.load %arg1[%c0, %c0_0, %c0_1, %c0_2] : memref<1x4x4x64xf32, #tpu.memory_space<vmem>>, vector<1x4x4x64xf32>
    %1 = vector.shape_cast %0 : vector<1x4x4x64xf32> to vector<4x4x64xf32>
    %cst = arith.constant dense<0xFF800000> : vector<4x64xf32>
    %2 = vector.multi_reduction <maximumf>, %1, %cst [0] : vector<4x4x64xf32> to vector<4x64xf32>
    %cst_3 = arith.constant 0.000000e+00 : f32
    %3 = vector.broadcast %cst_3 : f32 to vector<4x82xf32>
    %c0_4 = arith.constant 0 : index
    %c0_5 = arith.constant 0 : index
    %4 = vector.load %arg8[%c0_4, %c0_5] : memref<4x82xf32, #tpu.memory_space<vmem>>, vector<4x82xf32>
    tpu.vector_store %arg8[%c0_4, %c0_5], %3 {strides = array<i32>} : memref<4x82xf32, #tpu.memory_space<vmem>>, vector<4x82xf32>,
    %c0_6 = arith.constant 0 : index
    %c9 = arith.constant 9 : index
    %5 = vector.load %arg8[%c0_6, %c9] : memref<4x82xf32, #tpu.memory_space<vmem>>, vector<4x64xf32>
    tpu.vector_store %arg8[%c0_6, %c9], %2 {strides = array<i32>} : memref<4x82xf32, #tpu.memory_space<vmem>>, vector<4x64xf32>,
    %c0_7 = arith.constant 0 : index
    %c0_8 = arith.constant 0 : index
    %6 = vector.load %arg8[%c0_7, %c0_8] : memref<4x82xf32, #tpu.memory_space<vmem>>, vector<4x64xf32>
    %c0_9 = arith.constant 0 : index
    %c0_10 = arith.constant 0 : index
    %c0_11 = arith.constant 0 : index
    %7 = vector.load %arg2[%c0_9, %c0_10, %c0_11] : memref<9x1x64xf32, #tpu.memory_space<vmem>>, vector<1x1x64xf32>
    %8 = vector.shape_cast %7 : vector<1x1x64xf32> to vector<1x64xf32>
    %9 = vector.broadcast %8 : vector<1x64xf32> to vector<4x64xf32>
    %10 = arith.mulf %6, %9 : vector<4x64xf32>
    %c0_12 = arith.constant 0 : index
    %c0_13 = arith.constant 0 : index
    %11 = vector.load %arg9[%c0_12, %c0_13] : memref<36x64xf32, #tpu.memory_space<vmem>>, vector<4x64xf32>
    tpu.vector_store %arg9[%c0_12, %c0_13], %10 {strides = array<i32>} : memref<36x64xf32, #tpu.memory_space<vmem>>, vector<4x64xf32>,
    %c0_14 = arith.constant 0 : index
    %c1 = arith.constant 1 : index
    %12 = vector.load %arg8[%c0_14, %c1] : memref<4x82xf32, #tpu.memory_space<vmem>>, vector<4x64xf32>
    %c1_15 = arith.constant 1 : index
    %c0_16 = arith.constant 0 : index
    %c0_17 = arith.constant 0 : index
    %13 = vector.load %arg2[%c1_15, %c0_16, %c0_17] : memref<9x1x64xf32, #tpu.memory_space<vmem>>, vector<1x1x64xf32>
    %14 = vector.shape_cast %13 : vector<1x1x64xf32> to vector<1x64xf32>
    %15 = vector.broadcast %14 : vector<1x64xf32> to vector<4x64xf32>
    %16 = arith.mulf %12, %15 : vector<4x64xf32>
    %c4 = arith.constant 4 : index
    %c0_18 = arith.constant 0 : index
    %17 = vector.load %arg9[%c4, %c0_18] : memref<36x64xf32, #tpu.memory_space<vmem>>, vector<4x64xf32>
    tpu.vector_store %arg9[%c4, %c0_18], %16 {strides = array<i32>} : memref<36x64xf32, #tpu.memory_space<vmem>>, vector<4x64xf32>,
    %c0_19 = arith.constant 0 : index
    %c2 = arith.constant 2 : index
    %18 = vector.load %arg8[%c0_19, %c2] : memref<4x82xf32, #tpu.memory_space<vmem>>, vector<4x64xf32>
    %c2_20 = arith.constant 2 : index
    %c0_21 = arith.constant 0 : index
    %c0_22 = arith.constant 0 : index
    %19 = vector.load %arg2[%c2_20, %c0_21, %c0_22] : memref<9x1x64xf32, #tpu.memory_space<vmem>>, vector<1x1x64xf32>
    %20 = vector.shape_cast %19 : vector<1x1x64xf32> to vector<1x64xf32>
    %21 = vector.broadcast %20 : vector<1x64xf32> to vector<4x64xf32>
    %22 = arith.mulf %18, %21 : vector<4x64xf32>
    %c8 = arith.constant 8 : index
    %c0_23 = arith.constant 0 : index
    %23 = vector.load %arg9[%c8, %c0_23] : memref<36x64xf32, #tpu.memory_space<vmem>>, vector<4x64xf32>
    tpu.vector_store %arg9[%c8, %c0_23], %22 {strides = array<i32>} : memref<36x64xf32, #tpu.memory_space<vmem>>, vector<4x64xf32>,
    %c0_24 = arith.constant 0 : index
    %c8_25 = arith.constant 8 : index
    %24 = vector.load %arg8[%c0_24, %c8_25] : memref<4x82xf32, #tpu.memory_space<vmem>>, vector<4x64xf32>
    %c3 = arith.constant 3 : index
    %c0_26 = arith.constant 0 : index
    %c0_27 = arith.constant 0 : index
    %25 = vector.load %arg2[%c3, %c0_26, %c0_27] : memref<9x1x64xf32, #tpu.memory_space<vmem>>, vector<1x1x64xf32>
    %26 = vector.shape_cast %25 : vector<1x1x64xf32> to vector<1x64xf32>
    %27 = vector.broadcast %26 : vector<1x64xf32> to vector<4x64xf32>
    %28 = arith.mulf %24, %27 : vector<4x64xf32>
    %c12 = arith.constant 12 : index
    %c0_28 = arith.constant 0 : index
    %29 = vector.load %arg9[%c12, %c0_28] : memref<36x64xf32, #tpu.memory_space<vmem>>, vector<4x64xf32>
    tpu.vector_store %arg9[%c12, %c0_28], %28 {strides = array<i32>} : memref<36x64xf32, #tpu.memory_space<vmem>>, vector<4x64xf32>,
    %c0_29 = arith.constant 0 : index
    %c9_30 = arith.constant 9 : index
    %30 = vector.load %arg8[%c0_29, %c9_30] : memref<4x82xf32, #tpu.memory_space<vmem>>, vector<4x64xf32>
    %c4_31 = arith.constant 4 : index
    %c0_32 = arith.constant 0 : index
    %c0_33 = arith.constant 0 : index
    %31 = vector.load %arg2[%c4_31, %c0_32, %c0_33] : memref<9x1x64xf32, #tpu.memory_space<vmem>>, vector<1x1x64xf32>
    %32 = vector.shape_cast %31 : vector<1x1x64xf32> to vector<1x64xf32>
    %33 = vector.broadcast %32 : vector<1x64xf32> to vector<4x64xf32>
    %34 = arith.mulf %30, %33 : vector<4x64xf32>
    %c16 = arith.constant 16 : index
    %c0_34 = arith.constant 0 : index
    %35 = vector.load %arg9[%c16, %c0_34] : memref<36x64xf32, #tpu.memory_space<vmem>>, vector<4x64xf32>
    tpu.vector_store %arg9[%c16, %c0_34], %34 {strides = array<i32>} : memref<36x64xf32, #tpu.memory_space<vmem>>, vector<4x64xf32>,
    %c0_35 = arith.constant 0 : index
    %c10 = arith.constant 10 : index
    %36 = vector.load %arg8[%c0_35, %c10] : memref<4x82xf32, #tpu.memory_space<vmem>>, vector<4x64xf32>
    %c5 = arith.constant 5 : index
    %c0_36 = arith.constant 0 : index
    %c0_37 = arith.constant 0 : index
    %37 = vector.load %arg2[%c5, %c0_36, %c0_37] : memref<9x1x64xf32, #tpu.memory_space<vmem>>, vector<1x1x64xf32>
    %38 = vector.shape_cast %37 : vector<1x1x64xf32> to vector<1x64xf32>
    %39 = vector.broadcast %38 : vector<1x64xf32> to vector<4x64xf32>
    %40 = arith.mulf %36, %39 : vector<4x64xf32>
    %c20 = arith.constant 20 : index
    %c0_38 = arith.constant 0 : index
    %41 = vector.load %arg9[%c20, %c0_38] : memref<36x64xf32, #tpu.memory_space<vmem>>, vector<4x64xf32>
    tpu.vector_store %arg9[%c20, %c0_38], %40 {strides = array<i32>} : memref<36x64xf32, #tpu.memory_space<vmem>>, vector<4x64xf32>,
    %c0_39 = arith.constant 0 : index
    %c16_40 = arith.constant 16 : index
    %42 = vector.load %arg8[%c0_39, %c16_40] : memref<4x82xf32, #tpu.memory_space<vmem>>, vector<4x64xf32>
    %c6 = arith.constant 6 : index
    %c0_41 = arith.constant 0 : index
    %c0_42 = arith.constant 0 : index
    %43 = vector.load %arg2[%c6, %c0_41, %c0_42] : memref<9x1x64xf32, #tpu.memory_space<vmem>>, vector<1x1x64xf32>
    %44 = vector.shape_cast %43 : vector<1x1x64xf32> to vector<1x64xf32>
    %45 = vector.broadcast %44 : vector<1x64xf32> to vector<4x64xf32>
    %46 = arith.mulf %42, %45 : vector<4x64xf32>
    %c24 = arith.constant 24 : index
    %c0_43 = arith.constant 0 : index
    %47 = vector.load %arg9[%c24, %c0_43] : memref<36x64xf32, #tpu.memory_space<vmem>>, vector<4x64xf32>
    tpu.vector_store %arg9[%c24, %c0_43], %46 {strides = array<i32>} : memref<36x64xf32, #tpu.memory_space<vmem>>, vector<4x64xf32>,
    %c0_44 = arith.constant 0 : index
    %c17 = arith.constant 17 : index
    %48 = vector.load %arg8[%c0_44, %c17] : memref<4x82xf32, #tpu.memory_space<vmem>>, vector<4x64xf32>
    %c7 = arith.constant 7 : index
    %c0_45 = arith.constant 0 : index
    %c0_46 = arith.constant 0 : index
    %49 = vector.load %arg2[%c7, %c0_45, %c0_46] : memref<9x1x64xf32, #tpu.memory_space<vmem>>, vector<1x1x64xf32>
    %50 = vector.shape_cast %49 : vector<1x1x64xf32> to vector<1x64xf32>
    %51 = vector.broadcast %50 : vector<1x64xf32> to vector<4x64xf32>
    %52 = arith.mulf %48, %51 : vector<4x64xf32>
    %c28 = arith.constant 28 : index
    %c0_47 = arith.constant 0 : index
    %53 = vector.load %arg9[%c28, %c0_47] : memref<36x64xf32, #tpu.memory_space<vmem>>, vector<4x64xf32>
    tpu.vector_store %arg9[%c28, %c0_47], %52 {strides = array<i32>} : memref<36x64xf32, #tpu.memory_space<vmem>>, vector<4x64xf32>,
    %c0_48 = arith.constant 0 : index
    %c18 = arith.constant 18 : index
    %54 = vector.load %arg8[%c0_48, %c18] : memref<4x82xf32, #tpu.memory_space<vmem>>, vector<4x64xf32>
    %c8_49 = arith.constant 8 : index
    %c0_50 = arith.constant 0 : index
    %c0_51 = arith.constant 0 : index
    %55 = vector.load %arg2[%c8_49, %c0_50, %c0_51] : memref<9x1x64xf32, #tpu.memory_space<vmem>>, vector<1x1x64xf32>
    %56 = vector.shape_cast %55 : vector<1x1x64xf32> to vector<1x64xf32>
    %57 = vector.broadcast %56 : vector<1x64xf32> to vector<4x64xf32>
    %58 = arith.mulf %54, %57 : vector<4x64xf32>
    %c32 = arith.constant 32 : index
    %c0_52 = arith.constant 0 : index
    %59 = vector.load %arg9[%c32, %c0_52] : memref<36x64xf32, #tpu.memory_space<vmem>>, vector<4x64xf32>
    tpu.vector_store %arg9[%c32, %c0_52], %58 {strides = array<i32>} : memref<36x64xf32, #tpu.memory_space<vmem>>, vector<4x64xf32>,
    %c0_53 = arith.constant 0 : index
    %c0_54 = arith.constant 0 : index
    %60 = vector.load %arg3[%c0_53, %c0_54] : memref<8x36xf32, #tpu.memory_space<vmem>>, vector<8x36xf32>
    %c0_55 = arith.constant 0 : index
    %c0_56 = arith.constant 0 : index
    %61 = vector.load %arg9[%c0_55, %c0_56] : memref<36x64xf32, #tpu.memory_space<vmem>>, vector<36x64xf32>
    %cst_57 = arith.constant dense<0.000000e+00> : vector<8x64xf32>
    %62 = tpu.matmul %60, %61, %cst_57 {dimension_numbers = #tpu.dot_dimension_numbers<[1], [0], [0], [1], [0, 0, 1, 1], [], []>} : vector<8x36xf32>, vector<36x64xf32>, vector<8x64xf32> -> vector<8x64xf32>
    %c0_58 = arith.constant 0 : index
    %c0_59 = arith.constant 0 : index
    %63 = vector.load %arg4[%c0_58, %c0_59] : memref<8x1xf32, #tpu.memory_space<vmem>>, vector<8x1xf32>
    %64 = vector.broadcast %63 : vector<8x1xf32> to vector<8x64xf32>
    %65 = arith.addf %62, %64 : vector<8x64xf32>
    %cst_60 = arith.constant 0.000000e+00 : f32
    %66 = vector.broadcast %cst_60 : f32 to vector<8x64xf32>
    %67 = arith.maximumf %65, %66 : vector<8x64xf32>
    %cst_61 = arith.constant 0.000000e+00 : f32
    %68 = vector.broadcast %cst_61 : f32 to vector<8x82xf32>
    %c0_62 = arith.constant 0 : index
    %c0_63 = arith.constant 0 : index
    %69 = vector.load %arg10[%c0_62, %c0_63] : memref<8x82xf32, #tpu.memory_space<vmem>>, vector<8x82xf32>
    tpu.vector_store %arg10[%c0_62, %c0_63], %68 {strides = array<i32>} : memref<8x82xf32, #tpu.memory_space<vmem>>, vector<8x82xf32>,
    %c0_64 = arith.constant 0 : index
    %c9_65 = arith.constant 9 : index
    %70 = vector.load %arg10[%c0_64, %c9_65] : memref<8x82xf32, #tpu.memory_space<vmem>>, vector<8x64xf32>
    tpu.vector_store %arg10[%c0_64, %c9_65], %67 {strides = array<i32>} : memref<8x82xf32, #tpu.memory_space<vmem>>, vector<8x64xf32>,
    %c0_66 = arith.constant 0 : index
    %c0_67 = arith.constant 0 : index
    %71 = vector.load %arg10[%c0_66, %c0_67] : memref<8x82xf32, #tpu.memory_space<vmem>>, vector<8x64xf32>
    %c0_68 = arith.constant 0 : index
    %c0_69 = arith.constant 0 : index
    %c0_70 = arith.constant 0 : index
    %72 = vector.load %arg2[%c0_68, %c0_69, %c0_70] : memref<9x1x64xf32, #tpu.memory_space<vmem>>, vector<1x1x64xf32>
    %73 = vector.shape_cast %72 : vector<1x1x64xf32> to vector<1x64xf32>
    %74 = vector.broadcast %73 : vector<1x64xf32> to vector<8x64xf32>
    %75 = arith.mulf %71, %74 : vector<8x64xf32>
    %c0_71 = arith.constant 0 : index
    %c0_72 = arith.constant 0 : index
    %76 = vector.load %arg11[%c0_71, %c0_72] : memref<72x64xf32, #tpu.memory_space<vmem>>, vector<8x64xf32>
    tpu.vector_store %arg11[%c0_71, %c0_72], %75 {strides = array<i32>} : memref<72x64xf32, #tpu.memory_space<vmem>>, vector<8x64xf32>,
    %c0_73 = arith.constant 0 : index
    %c1_74 = arith.constant 1 : index
    %77 = vector.load %arg10[%c0_73, %c1_74] : memref<8x82xf32, #tpu.memory_space<vmem>>, vector<8x64xf32>
    %c1_75 = arith.constant 1 : index
    %c0_76 = arith.constant 0 : index
    %c0_77 = arith.constant 0 : index
    %78 = vector.load %arg2[%c1_75, %c0_76, %c0_77] : memref<9x1x64xf32, #tpu.memory_space<vmem>>, vector<1x1x64xf32>
    %79 = vector.shape_cast %78 : vector<1x1x64xf32> to vector<1x64xf32>
    %80 = vector.broadcast %79 : vector<1x64xf32> to vector<8x64xf32>
    %81 = arith.mulf %77, %80 : vector<8x64xf32>
    %c8_78 = arith.constant 8 : index
    %c0_79 = arith.constant 0 : index
    %82 = vector.load %arg11[%c8_78, %c0_79] : memref<72x64xf32, #tpu.memory_space<vmem>>, vector<8x64xf32>
    tpu.vector_store %arg11[%c8_78, %c0_79], %81 {strides = array<i32>} : memref<72x64xf32, #tpu.memory_space<vmem>>, vector<8x64xf32>,
    %c0_80 = arith.constant 0 : index
    %c2_81 = arith.constant 2 : index
    %83 = vector.load %arg10[%c0_80, %c2_81] : memref<8x82xf32, #tpu.memory_space<vmem>>, vector<8x64xf32>
    %c2_82 = arith.constant 2 : index
    %c0_83 = arith.constant 0 : index
    %c0_84 = arith.constant 0 : index
    %84 = vector.load %arg2[%c2_82, %c0_83, %c0_84] : memref<9x1x64xf32, #tpu.memory_space<vmem>>, vector<1x1x64xf32>
    %85 = vector.shape_cast %84 : vector<1x1x64xf32> to vector<1x64xf32>
    %86 = vector.broadcast %85 : vector<1x64xf32> to vector<8x64xf32>
    %87 = arith.mulf %83, %86 : vector<8x64xf32>
    %c16_85 = arith.constant 16 : index
    %c0_86 = arith.constant 0 : index
    %88 = vector.load %arg11[%c16_85, %c0_86] : memref<72x64xf32, #tpu.memory_space<vmem>>, vector<8x64xf32>
    tpu.vector_store %arg11[%c16_85, %c0_86], %87 {strides = array<i32>} : memref<72x64xf32, #tpu.memory_space<vmem>>, vector<8x64xf32>,
    %c0_87 = arith.constant 0 : index
    %c8_88 = arith.constant 8 : index
    %89 = vector.load %arg10[%c0_87, %c8_88] : memref<8x82xf32, #tpu.memory_space<vmem>>, vector<8x64xf32>
    %c3_89 = arith.constant 3 : index
    %c0_90 = arith.constant 0 : index
    %c0_91 = arith.constant 0 : index
    %90 = vector.load %arg2[%c3_89, %c0_90, %c0_91] : memref<9x1x64xf32, #tpu.memory_space<vmem>>, vector<1x1x64xf32>
    %91 = vector.shape_cast %90 : vector<1x1x64xf32> to vector<1x64xf32>
    %92 = vector.broadcast %91 : vector<1x64xf32> to vector<8x64xf32>
    %93 = arith.mulf %89, %92 : vector<8x64xf32>
    %c24_92 = arith.constant 24 : index
    %c0_93 = arith.constant 0 : index
    %94 = vector.load %arg11[%c24_92, %c0_93] : memref<72x64xf32, #tpu.memory_space<vmem>>, vector<8x64xf32>
    tpu.vector_store %arg11[%c24_92, %c0_93], %93 {strides = array<i32>} : memref<72x64xf32, #tpu.memory_space<vmem>>, vector<8x64xf32>,
    %c0_94 = arith.constant 0 : index
    %c9_95 = arith.constant 9 : index
    %95 = vector.load %arg10[%c0_94, %c9_95] : memref<8x82xf32, #tpu.memory_space<vmem>>, vector<8x64xf32>
    %c4_96 = arith.constant 4 : index
    %c0_97 = arith.constant 0 : index
    %c0_98 = arith.constant 0 : index
    %96 = vector.load %arg2[%c4_96, %c0_97, %c0_98] : memref<9x1x64xf32, #tpu.memory_space<vmem>>, vector<1x1x64xf32>
    %97 = vector.shape_cast %96 : vector<1x1x64xf32> to vector<1x64xf32>
    %98 = vector.broadcast %97 : vector<1x64xf32> to vector<8x64xf32>
    %99 = arith.mulf %95, %98 : vector<8x64xf32>
    %c32_99 = arith.constant 32 : index
    %c0_100 = arith.constant 0 : index
    %100 = vector.load %arg11[%c32_99, %c0_100] : memref<72x64xf32, #tpu.memory_space<vmem>>, vector<8x64xf32>
    tpu.vector_store %arg11[%c32_99, %c0_100], %99 {strides = array<i32>} : memref<72x64xf32, #tpu.memory_space<vmem>>, vector<8x64xf32>,
    %c0_101 = arith.constant 0 : index
    %c10_102 = arith.constant 10 : index
    %101 = vector.load %arg10[%c0_101, %c10_102] : memref<8x82xf32, #tpu.memory_space<vmem>>, vector<8x64xf32>
    %c5_103 = arith.constant 5 : index
    %c0_104 = arith.constant 0 : index
    %c0_105 = arith.constant 0 : index
    %102 = vector.load %arg2[%c5_103, %c0_104, %c0_105] : memref<9x1x64xf32, #tpu.memory_space<vmem>>, vector<1x1x64xf32>
    %103 = vector.shape_cast %102 : vector<1x1x64xf32> to vector<1x64xf32>
    %104 = vector.broadcast %103 : vector<1x64xf32> to vector<8x64xf32>
    %105 = arith.mulf %101, %104 : vector<8x64xf32>
    %c40 = arith.constant 40 : index
    %c0_106 = arith.constant 0 : index
    %106 = vector.load %arg11[%c40, %c0_106] : memref<72x64xf32, #tpu.memory_space<vmem>>, vector<8x64xf32>
    tpu.vector_store %arg11[%c40, %c0_106], %105 {strides = array<i32>} : memref<72x64xf32, #tpu.memory_space<vmem>>, vector<8x64xf32>,
    %c0_107 = arith.constant 0 : index
    %c16_108 = arith.constant 16 : index
    %107 = vector.load %arg10[%c0_107, %c16_108] : memref<8x82xf32, #tpu.memory_space<vmem>>, vector<8x64xf32>
    %c6_109 = arith.constant 6 : index
    %c0_110 = arith.constant 0 : index
    %c0_111 = arith.constant 0 : index
    %108 = vector.load %arg2[%c6_109, %c0_110, %c0_111] : memref<9x1x64xf32, #tpu.memory_space<vmem>>, vector<1x1x64xf32>
    %109 = vector.shape_cast %108 : vector<1x1x64xf32> to vector<1x64xf32>
    %110 = vector.broadcast %109 : vector<1x64xf32> to vector<8x64xf32>
    %111 = arith.mulf %107, %110 : vector<8x64xf32>
    %c48 = arith.constant 48 : index
    %c0_112 = arith.constant 0 : index
    %112 = vector.load %arg11[%c48, %c0_112] : memref<72x64xf32, #tpu.memory_space<vmem>>, vector<8x64xf32>
    tpu.vector_store %arg11[%c48, %c0_112], %111 {strides = array<i32>} : memref<72x64xf32, #tpu.memory_space<vmem>>, vector<8x64xf32>,
    %c0_113 = arith.constant 0 : index
    %c17_114 = arith.constant 17 : index
    %113 = vector.load %arg10[%c0_113, %c17_114] : memref<8x82xf32, #tpu.memory_space<vmem>>, vector<8x64xf32>
    %c7_115 = arith.constant 7 : index
    %c0_116 = arith.constant 0 : index
    %c0_117 = arith.constant 0 : index
    %114 = vector.load %arg2[%c7_115, %c0_116, %c0_117] : memref<9x1x64xf32, #tpu.memory_space<vmem>>, vector<1x1x64xf32>
    %115 = vector.shape_cast %114 : vector<1x1x64xf32> to vector<1x64xf32>
    %116 = vector.broadcast %115 : vector<1x64xf32> to vector<8x64xf32>
    %117 = arith.mulf %113, %116 : vector<8x64xf32>
    %c56 = arith.constant 56 : index
    %c0_118 = arith.constant 0 : index
    %118 = vector.load %arg11[%c56, %c0_118] : memref<72x64xf32, #tpu.memory_space<vmem>>, vector<8x64xf32>
    tpu.vector_store %arg11[%c56, %c0_118], %117 {strides = array<i32>} : memref<72x64xf32, #tpu.memory_space<vmem>>, vector<8x64xf32>,
    %c0_119 = arith.constant 0 : index
    %c18_120 = arith.constant 18 : index
    %119 = vector.load %arg10[%c0_119, %c18_120] : memref<8x82xf32, #tpu.memory_space<vmem>>, vector<8x64xf32>
    %c8_121 = arith.constant 8 : index
    %c0_122 = arith.constant 0 : index
    %c0_123 = arith.constant 0 : index
    %120 = vector.load %arg2[%c8_121, %c0_122, %c0_123] : memref<9x1x64xf32, #tpu.memory_space<vmem>>, vector<1x1x64xf32>
    %121 = vector.shape_cast %120 : vector<1x1x64xf32> to vector<1x64xf32>
    %122 = vector.broadcast %121 : vector<1x64xf32> to vector<8x64xf32>
    %123 = arith.mulf %119, %122 : vector<8x64xf32>
    %c64 = arith.constant 64 : index
    %c0_124 = arith.constant 0 : index
    %124 = vector.load %arg11[%c64, %c0_124] : memref<72x64xf32, #tpu.memory_space<vmem>>, vector<8x64xf32>
    tpu.vector_store %arg11[%c64, %c0_124], %123 {strides = array<i32>} : memref<72x64xf32, #tpu.memory_space<vmem>>, vector<8x64xf32>,
    %c0_125 = arith.constant 0 : index
    %c0_126 = arith.constant 0 : index
    %125 = vector.load %arg5[%c0_125, %c0_126] : memref<8x72xf32, #tpu.memory_space<vmem>>, vector<8x72xf32>
    %c0_127 = arith.constant 0 : index
    %c0_128 = arith.constant 0 : index
    %126 = vector.load %arg11[%c0_127, %c0_128] : memref<72x64xf32, #tpu.memory_space<vmem>>, vector<72x64xf32>
    %cst_129 = arith.constant dense<0.000000e+00> : vector<8x64xf32>
    %127 = tpu.matmul %125, %126, %cst_129 {dimension_numbers = #tpu.dot_dimension_numbers<[1], [0], [0], [1], [0, 0, 1, 1], [], []>} : vector<8x72xf32>, vector<72x64xf32>, vector<8x64xf32> -> vector<8x64xf32>
    %c0_130 = arith.constant 0 : index
    %c0_131 = arith.constant 0 : index
    %128 = vector.load %arg6[%c0_130, %c0_131] : memref<8x1xf32, #tpu.memory_space<vmem>>, vector<8x1xf32>
    %129 = vector.broadcast %128 : vector<8x1xf32> to vector<8x64xf32>
    %130 = arith.addf %127, %129 : vector<8x64xf32>
    %cst_132 = arith.constant 0.000000e+00 : f32
    %131 = vector.broadcast %cst_132 : f32 to vector<8x64xf32>
    %132 = arith.maximumf %130, %131 : vector<8x64xf32>
    %c0_133 = arith.constant 0 : index
    %c0_134 = arith.constant 0 : index
    %c0_135 = arith.constant 0 : index
    %133 = vector.load %arg7[%c0_133, %c0_134, %c0_135] : memref<1x8x64xf32, #tpu.memory_space<vmem>>, vector<1x8x64xf32>
    %134 = vector.shape_cast %133 : vector<1x8x64xf32> to vector<8x64xf32>
    %135 = vector.shape_cast %132 : vector<8x64xf32> to vector<1x8x64xf32>
    tpu.vector_store %arg7[%c0_133, %c0_134, %c0_135], %135 {strides = array<i32>} : memref<1x8x64xf32, #tpu.memory_space<vmem>>, vector<1x8x64xf32>,
    return
  }
  func.func @transform_0(%arg0: i32) -> (i32, i32, i32, i32) {
    %c0_i32 = arith.constant 0 : i32
    %c0_i32_0 = arith.constant 0 : i32
    %c0_i32_1 = arith.constant 0 : i32
    %c0_i32_2 = arith.constant 0 : i32
    return %arg0, %c0_i32, %c0_i32_0, %c0_i32_1 : i32, i32, i32, i32
  }
  func.func @transform_1(%arg0: i32) -> (i32, i32, i32) {
    %c0_i32 = arith.constant 0 : i32
    %c0_i32_0 = arith.constant 0 : i32
    %c0_i32_1 = arith.constant 0 : i32
    %c0_i32_2 = arith.constant 0 : i32
    return %c0_i32, %c0_i32_0, %c0_i32_1 : i32, i32, i32
  }
  func.func @transform_2(%arg0: i32) -> (i32, i32) {
    %c0_i32 = arith.constant 0 : i32
    %c0_i32_0 = arith.constant 0 : i32
    %c0_i32_1 = arith.constant 0 : i32
    return %c0_i32, %c0_i32_0 : i32, i32
  }
  func.func @transform_3(%arg0: i32) -> (i32, i32) {
    %c0_i32 = arith.constant 0 : i32
    %c0_i32_0 = arith.constant 0 : i32
    %c0_i32_1 = arith.constant 0 : i32
    return %c0_i32, %c0_i32_0 : i32, i32
  }
  func.func @transform_4(%arg0: i32) -> (i32, i32) {
    %c0_i32 = arith.constant 0 : i32
    %c0_i32_0 = arith.constant 0 : i32
    %c0_i32_1 = arith.constant 0 : i32
    return %c0_i32, %c0_i32_0 : i32, i32
  }
  func.func @transform_5(%arg0: i32) -> (i32, i32) {
    %c0_i32 = arith.constant 0 : i32
    %c0_i32_0 = arith.constant 0 : i32
    %c0_i32_1 = arith.constant 0 : i32
    return %c0_i32, %c0_i32_0 : i32, i32
  }
  func.func @transform_6(%arg0: i32) -> (i32, i32, i32) {
    %c0_i32 = arith.constant 0 : i32
    %c0_i32_0 = arith.constant 0 : i32
    %c0_i32_1 = arith.constant 0 : i32
    return %arg0, %c0_i32, %c0_i32_0 : i32, i32, i32
  }
}

</mosaic_0001>

<bundles_post_ra>
// kernel: tpu_custom_call.1
= control target key start
LH: loop header
LB: loop body
LE: loop exit
PB: predicated region body
PF: predicated region fallthrough
CT: control target
= control target key end

     0   :  { %11 = vsyncpa [#allocation7], 0  ;;  %s1463_s0 = inlined_call_operand.hbm [shape: f32[2,4,4,64], index: 0, kind: input, shape index: {}]   ;;  %s1464_s1 = inlined_call_operand.vmem [shape: f32[9,1,64], index: 1, kind: input, shape index: {}]   ;;  %s1465_s2 = inlined_call_operand.vmem [shape: f32[8,36], index: 2, kind: input, shape index: {}]   ;;  %s1466_s3 = inlined_call_operand.vmem [shape: f32[8,1], index: 3, kind: input, shape index: {}]   ;;  %s1467_s4 = inlined_call_operand.vmem [shape: f32[8,72], index: 4, kind: input, shape index: {}]   ;;  %s1468_s5 = inlined_call_operand.vmem [shape: f32[8,1], index: 5, kind: input, shape index: {}]   ;;  %s1469_s6 = inlined_call_operand.hbm [shape: f32[2,8,64], index: 6, kind: output, shape index: {}]  }
   0x1   :  { %13 = vsyncpa [#allocation7 + $0x1], 0 }
   0x2   :  { %14 = vsyncpa [#allocation8], 0 }
   0x3   :  { %16 = vsyncpa [#allocation8 + $0x1], 0  ;;  %s1172_s21 = smov 0   ;;  %s1174_s22 = smov 0  }
   0x4   :  { %s1176_s23 = smov 0   ;;  %s1178_s24 = smov 0  }
   0x5 LB: > { %s1193_s25 = sadd.s32 4294967295, %s1112_s24   ;;  %s850_s26 = sadd.s32 4294967294, %s1112_s24   ;;  %s1112_s24 = sphi %s1178_s24, %s1492_s24   ;;  %s1108_s23 = sphi %s1176_s23, %s1491_s23   ;;  %s1104_s22 = sphi %s1174_s22, %s1490_s22   ;;  %s1100_s21 = sphi %s1172_s21, %s1489_s21  }
   0x6   : > { %s1197_s27 = sadd.s32 1, %s1112_s24   ;;  %s29_s28 = sadd.s32 1, %s1108_s23 }
   0x7   : > { %s26_s29 = ssub.s32 %s1112_s24, %s1197_s27  ;;  %p36_p0 = scmp.ne.s32.totalorder %s1108_s23, %s1104_s22 }
   0x8   : > { %p27_p1 = scmp.eq.s32.totalorder %s26_s29, 0  ;;  %p37_p2 = scmp.eq.s32.totalorder %s1112_s24, 0 }
   0x9   : > { %p42_p3 = scmp.ne.s32.totalorder %s1104_s22, %s1100_s21  ;;  %p43_p4 = scmp.eq.s32.totalorder %s1193_s25, 0 }
   0xa   : > { %s1209_s30 = scalar_select %p27_p1, %s1108_s23, %s29_s28  }
   0xb   : > { %p1211_p5 = por %p37_p2, %p36_p0  ;;  %p1215_p6 = por %p43_p4, %p42_p3 }
   0xc   : > { %p171_p7 = scmp.eq.s32.totalorder %s1193_s25, 1  ;;  %p177_p8 = scmp.eq.s32.totalorder %s850_s26, 1 }
   0xd   : > { %s1477_s8 = scalar_select %p1215_p6, 1, 0 }
   0xe   : > { %p963_p10 = scmp.lt.s32.totalorder %s1112_s24, 2  ;;  %p1222_p11 = por %p171_p7, %p36_p0 }
   0xf   : > { %p1226_p12 = por %p177_p8, %p42_p3  ;;  %s212_s11 = sand.u32 1, %s1108_s23  }
  0x10   : > { %s1478_s9 = scalar_select %p1222_p11, 1, 0 }
  0x11   : > { %s1479_s10 = scalar_select %p1226_p12, 1, 0 }
  0x12   : > { %s900_s12 = sshll.u32 %s1112_s24, 8  ;;  %s853_s13 = sshll.u32 %s212_s11, 4 }
  0x13   : > { %s1235_s16 = scalar_lea.hbm %s1463_s0, %s900_s12  ;;  %s216_s17 = scalar_lea.vmem [#allocation6], %s853_s13 }
  0x14   : > { %s223_s18 = sshll.u32 %s216_s17, 4  ;;  %p1239_p13 = pnand %p963_p10, %p1211_p5  ;;  %s1243_s18 = int_to_ptr.vmem [resolvable:$true] %s223_s18 }
  0x15   : > { %s1245_s20 = scalar_lea.sflag [#allocation7], %s212_s11  ;;  %s1020_s26 = scalar_lea.hbm %s1235_s16, 256 }
  0x16   : > { %p1021_p0 = scmp.ne.s32.totalorder %s1235_s16, %s1020_s26  ;;  %p1022_p1 = pneg %p1239_p13 }
  0x17   : > { %s1025_s12 = scalar_lea.hbm %s1463_s0, 512  ;;  %p1026_p4 = scmp.lt.s32.totalorder %s1235_s16, %s1463_s0 }
  0x18   : > { %p1023_p2 = pnand %p1022_p1, %p1021_p0  ;;  %p1027_p5 = scmp.lt.s32.totalorder %s1025_s12, %s1020_s26 }
  0x1a   : > { %p1024_p3 = pneg %p1023_p2  ;;  %p1028_p7 = por %p1027_p5, %p1026_p4 }
  0x1c   : > { %p1029_p8 = pnand %p1028_p7, %p1024_p3 }
  0x1e   : > { %1032 = shalt.err (!%p1029_p8)
}
  0x1f   : > { %s1033_s11 = scalar_lea.vmem %s1243_s18, 256  ;;  %s1114_s14 = smov [#allocation6]  }
  0x20   : > { %p1034_p10 = scmp.ne.s32.totalorder %s1243_s18, %s1033_s11  ;;  %s1038_s15 = sshll.u32 %s1114_s14, 4  ;;  %s1039_s15 = int_to_ptr.vmem [resolvable:$false] %s1038_s15 }
  0x21   : > { %s1040_s17 = scalar_lea.vmem %s1039_s15, 512  ;;  %p1041_p2 = scmp.lt.s32.totalorder %s1243_s18, %s1039_s15 }
  0x22   : > { %p1036_p9 = pnand %p1034_p10, %p1022_p1  ;;  %p1042_p12 = scmp.lt.s32.totalorder %s1040_s17, %s1033_s11 }
  0x24   : > { %p1037_p0 = pneg %p1036_p9  ;;  %p1043_p11 = por %p1042_p12, %p1041_p2 }
  0x26   : > { %p1044_p6 = pnand %p1043_p11, %p1037_p0 }
  0x28   : > { %1047 = shalt.err (!%p1044_p6)
}
  0x29   : > { %s1115_s26 = smov 64   ;;  %s1116_s28 = smov 4  }
  0x2a   : > { %958 = dma.hbm_to_vmem [thread:$0]  (!%p1239_p13), %s1235_s16, 256, %s1243_s18, %s1245_s20, %s1115_s26, %s1115_s26, %s1116_s28  }
  0x2b   : > { %p856_p9 = scmp.ge.s32.totalorder %s1112_s24, 1  ;;  %p231_p1 = scmp.lt.s32.totalorder %s1112_s24, 3 }
  0x2d   : > { %p232_p3 = pnand %p856_p9, %p231_p1 }
  0x2e   : > { %s1269_s29 = sand.u32 (!%p232_p3), 1, %s1104_s22   ;;  %p1481_p6 = scmp.ne.s32.totalorder (!%p232_p3), %s1477_s8, 0 }
  0x2f   : > { %235 = sbr.rel (%p232_p3) target bundleno = 997 (0x3e5), region = 44  ;;  %s857_s12 = sshll.u32 (!%p232_p3), %s1269_s29, 4 }
  0x30   : > { %s238_s7 = scalar_lea.sflag (!%p232_p3), [#allocation7], %s1269_s29  ;;  %s241_s13 = scalar_lea.vmem (!%p232_p3), [#allocation6], %s857_s12 }
  0x34   : > { %1091 = dma.done.wait (%p1481_p6), %s238_s7, 256  }
  0x35   : > { %1093 = vsyncadd (%p1481_p6), %s238_s7, 4294967040  ;;  %vm282_vm0 = vcmask 666624   ;;  %v1117_v0 = vmov 0.0   ;;  %vm274_vm1 = vcmask 519168   ;;  %v1283_v1 = vld [vmem:[%s1464_s1 + $0x6] ss:$0 sm:$0xff] }
  0x36   : > { %283 = vst.msk [vmem:[#allocation2] sm:$0xf] %vm282_vm0, %v1117_v0  ;;  %917 = vmatprep.subr.mxu0 %v1117_v0  ;;  %930 = vmatprep.subr.mxu1 %v1117_v0  ;;  %v270_v2 = vld [vmem:[%s241_s13] sm:$0xf]  ;;  %s1118_s19 = smov 16   ;;  %s1119_s11 = smov 17  }
  0x37   : > { %393 = vrot.lane.b32.xlu1 %v1283_v1, %s1118_s19  ;;  %v271_v3 = vld [vmem:[%s241_s13 + $0x4] sm:$0xf]  ;;  %v272_v4 = vld [vmem:[%s241_s13 + $0x8] sm:$0xf]  ;;  %v273_v5 = vld [vmem:[%s241_s13 + $0xc] sm:$0xf] }
  0x38   : > { %v1290_v6 = vld [vmem:[%s1464_s1 + $0x7] ss:$0 sm:$0xff]  ;;  %v275_v7 = vsel %vm274_vm1, %v270_v2, -inf  ;;  %v276_v8 = vsel %vm274_vm1, %v271_v3, -inf  ;;  %v277_v9 = vsel %vm274_vm1, %v272_v4, -inf  ;;  %v278_v10 = vsel %vm274_vm1, %v273_v5, -inf }
  0x39   : > { %v279_v11 = vmax.f32 %v275_v7, %v276_v8  ;;  %v280_v12 = vmax.f32 %v277_v9, %v278_v10  ;;  %v1301_v14 = vld [vmem:[%s1464_s1 + $0x5] ss:$0 sm:$0xff]  ;;  %s1120_s17 = smov 9   ;;  %v1307_v15 = vld [vmem:[%s1464_s1 + $0x8] ss:$0 sm:$0xff]  ;;  %s1121_s12 = smov 10  }
  0x3a   : > { %v1314_v16 = vld [vmem:[%s1464_s1 + $0x3] ss:$0 sm:$0xff]  ;;  %s1122_s16 = smov 18   ;;  %v1321_v17 = vld [vmem:[%s1464_s1 + $0x4] ss:$0 sm:$0xff]  ;;  %s1123_s20 = smov 8  }
  0x3b   : > { %410 = vrot.lane.b32.xlu1 %v1290_v6, %s1119_s11  ;;  %v281_v13 = vmax.f32 %v279_v11, %v280_v12  ;;  %v1330_v18 = vld [vmem:[%s1464_s1 + $0x2] ss:$0 sm:$0xff]  ;;  %s1124_s26 = smov 2   ;;  %v1337_v19 = vld [vmem:[%s1464_s1 + $0x1] ss:$0 sm:$0xff]  ;;  %s1125_s13 = smov 1  }
  0x3c   : > { %vm288_vm2 = vcmask 592968   ;;  %v1344_v24 = vld [vmem:[%s1464_s1] ss:$0 sm:$0xff]  ;;  %s1475_s14 = smov 110   ;;  %s1473_s15 = smov 112   ;;  %vm1132_vm3 = vmmov 0  }
  0x3d   : > { %285 = vrot.lane.b32.xlu0 %v281_v13, %s1120_s17  ;;  %s1128_s28 = smov 111   ;;  %s1472_s7 = smov 119   ;;  %927 = vmatprep.mubr.msk.f32.mxu0 %vm1132_vm3, %v1117_v0  ;;  %v1133_v48 = vmov 0   ;;  %v442_v49 = vld [vmem:[%s1466_s3] sm:$0xff]  ;;  %vm452_vm4 = vcmask 1043456   ;;  %vm448_vm5 = vcmask 293888  }
  0x3e   : > { %s1474_s18 = smov 118   ;;  %s1131_s8 = smov 126   ;;  %948 = vmatprep.mubr.msk.f32.mxu1 %vm1132_vm3, %v1117_v0  ;;  %1018 = vset.pattern.permute.xlu1 %v1133_v48  ;;  %v436_v62 = vld [vmem:[%s1465_s2] sm:$0xff]  ;;  %vm527_vm6 = vcmask 670720   ;;  %vm533_vm7 = vcmask 597064   ;;  %vm544_vm8 = vcmask 523264  }
  0x3f   : > { %376 = vrot.lane.b32.xlu1 %v1301_v14, %s1121_s12  ;;  %1019 = vset.pattern.permute.xlu0 %v1133_v48  ;;  %528 = vst.msk [vmem:[#allocation4] sm:$0xff] %vm527_vm6, %v1117_v0  ;;  %vm690_vm9 = vcmask 588800   ;;  %p1486_p12 = scmp.ne.s32.totalorder %s1478_s9, 0 }
  0x41   : > { %427 = vrot.lane.b32.xlu0 %v1307_v15, %s1122_s16 }
  0x43   : > { %342 = vrot.lane.b32.xlu1 %v1314_v16, %s1123_s20 }
  0x45   : > { %359 = vrot.lane.b32.xlu0 %v1321_v17, %s1120_s17 }
  0x49   : > { %325 = vrot.lane.b32.xlu0 %v1330_v18, %s1124_s26 }
  0x4d   : > { %308 = vrot.lane.b32.xlu0 %v1337_v19, %s1125_s13 }
  0xa9   : > { %v394_v20 = vpop.permute.xlu1 %393 }
  0xad   : > { %v411_v23 = vpop.permute.xlu1 %410 }
  0xaf   : > { %v286_v21 = vpop.permute.xlu0 %285 }
  0xb0   : > { %289 = vst.msk [vmem:[#allocation2] sm:$0xf] %vm288_vm2, %v286_v21 }
  0xb1   : > { %v377_v34 = vpop.permute.xlu1 %376 }
  0xb3   : > { %v428_v22 = vpop.permute.xlu0 %427 }
  0xb5   : > { %v343_v41 = vpop.permute.xlu1 %342 }
  0xb7   : > { %v290_v25 = vld [vmem:[#allocation2] sm:$0xf]  ;;  %v360_v27 = vpop.permute.xlu0 %359 }
  0xb8   : > { %v419_v26 = vld [vmem:[#allocation2] sm:$0xf]  ;;  %v298_v28 = vmul.f32 %v1344_v24, %v290_v25 }
  0xb9   : > { %v430_v29 = vmul.f32 %v428_v22, %v419_v26  ;;  %v385_v30 = vld [vmem:[#allocation2] sm:$0xf] }
  0xba   : > { %v396_v31 = vmul.f32 %v394_v20, %v385_v30  ;;  %v402_v32 = vld [vmem:[#allocation2] sm:$0xf]  ;;  %299 = vst.msk [vmem:[#allocation3] sm:$0xf] %vm274_vm1, %v298_v28 }
  0xbb   : > { %v351_v33 = vld [vmem:[#allocation2] sm:$0xf]  ;;  %432 = vrot.lane.b32.xlu1 %v430_v29, %s1475_s14  ;;  %v326_v35 = vpop.permute.xlu0 %325  ;;  %v413_v36 = vmul.f32 %v411_v23, %v402_v32 }
  0xbc   : > { %398 = vrot.lane.b32.xlu0 %v396_v31, %s1473_s15  ;;  %v368_v37 = vld [vmem:[#allocation2] sm:$0xf]  ;;  %v362_v38 = vmul.f32 %v360_v27, %v351_v33  ;;  %s1135_s15 = smov 127  }
  0xbd   : > { %v379_v39 = vmul.f32 %v377_v34, %v368_v37  ;;  %v317_v40 = vld [vmem:[#allocation2] sm:$0xf] }
  0xbe   : > { %v334_v42 = vld [vmem:[#allocation2] sm:$0xf]  ;;  %v328_v43 = vmul.f32 %v326_v35, %v317_v40 }
  0xbf   : > { %415 = vrot.lane.b32.xlu1 %v413_v36, %s1128_s28  ;;  %v309_v44 = vpop.permute.xlu0 %308  ;;  %v345_v45 = vmul.f32 %v343_v41, %v334_v42  ;;  %v300_v46 = vld [vmem:[#allocation2] sm:$0xf] }
  0xc0   : > { %364 = vrot.lane.b32.xlu0 %v362_v38, %s1472_s7  ;;  %v311_v47 = vmul.f32 %v309_v44, %v300_v46  ;;  %s1134_s7 = smov 120   ;;  %v684_v25 = vld [vmem:[%s1468_s5] sm:$0xff] }
  0xc1   : > { %v674_v42 = vld [vmem:[%s1467_s4] sm:$0xff] }
  0xc3   : > { %381 = vrot.lane.b32.xlu1 %v379_v39, %s1474_s18 }
  0xc4   : > { %330 = vrot.lane.b32.xlu0 %v328_v43, %s1131_s8 }
  0xc7   : > { %347 = vrot.lane.b32.xlu1 %v345_v45, %s1134_s7 }
  0xc8   : > { %313 = vrot.lane.b32.xlu0 %v311_v47, %s1135_s15 }
  0xcb   : > { %445 = vperm.xlu1 %1018, %v442_v49  }
  0xcf   : > { %665 = vrot.lane.b32.xlu1 %v1307_v15, %s1122_s16 }
  0xd3   : > { %633 = vrot.lane.b32.xlu1 %v1283_v1, %s1118_s19 }
  0xd7   : > { %601 = vrot.lane.b32.xlu1 %v1321_v17, %s1120_s17 }
  0xdb   : > { %569 = vrot.lane.b32.xlu1 %v1330_v18, %s1124_s26 }
 0x12d   : > { %v433_v50 = vpop.permute.xlu1 %432 }
 0x12e   : > { %435 = vst.msk [vmem:[#allocation3 + $0x20] sm:$0xf] %vm274_vm1, %v433_v50  ;;  %v399_v51 = vpop.permute.xlu0 %398 }
 0x12f   : > { %401 = vst.msk [vmem:[#allocation3 + $0x18] sm:$0xf] %vm274_vm1, %v399_v51 }
 0x131   : > { %v416_v52 = vpop.permute.xlu1 %415 }
 0x132   : > { %418 = vst.msk [vmem:[#allocation3 + $0x1c] sm:$0xf] %vm274_vm1, %v416_v52  ;;  %v365_v53 = vpop.permute.xlu0 %364 }
 0x133   : > { %367 = vst.msk [vmem:[#allocation3 + $0x10] sm:$0xf] %vm274_vm1, %v365_v53 }
 0x135   : > { %v382_v54 = vpop.permute.xlu1 %381  ;;  %v441_v55 = vld [vmem:[#allocation3 + $0x20] sm:$0xf] }
 0x136   : > { %384 = vst.msk [vmem:[#allocation3 + $0x14] sm:$0xf] %vm274_vm1, %v382_v54  ;;  %v331_v56 = vpop.permute.xlu0 %330  ;;  %918 = vmatpush3.msk.msra.mxu0 %vm452_vm4, %v441_v55 }
 0x137   : > { %333 = vst.msk [vmem:[#allocation3 + $0x8] sm:$0xf] %vm274_vm1, %v331_v56  ;;  %919 = vmatprep.subr.mxu0 %v1117_v0 }
 0x139   : > { %v348_v57 = vpop.permute.xlu1 %347  ;;  %v440_v58 = vld [vmem:[#allocation3 + $0x18] sm:$0xff] }
 0x13a   : > { %350 = vst.msk [vmem:[#allocation3 + $0xc] sm:$0xf] %vm274_vm1, %v348_v57  ;;  %v314_v59 = vpop.permute.xlu0 %313  ;;  %920 = vmatpush3.msra.mxu0 %v440_v58 }
 0x13b   : > { %316 = vst.msk [vmem:[#allocation3 + $0x4] sm:$0xf] %vm274_vm1, %v314_v59  ;;  %921 = vmatprep.subr.mxu0 %v1117_v0 }
 0x13d   : > { %v439_v60 = vld [vmem:[#allocation3 + $0x10] sm:$0xff] }
 0x13e   : > { %922 = vmatpush3.msra.mxu0 %v439_v60 }
 0x13f   : > { %923 = vmatprep.subr.mxu0 %v1117_v0 }
 0x141   : > { %v438_v61 = vld [vmem:[#allocation3 + $0x8] sm:$0xff] }
 0x142   : > { %924 = vmatpush3.msra.mxu0 %v438_v61  ;;  %v437_v63 = vld [vmem:[#allocation3] sm:$0xff] }
 0x143   : > { %925 = vmatprep.subr.mxu0 %v1117_v0 }
 0x144   : > { %926 = vmatpush3.msra.mxu0 %v437_v63 }
 0x145   : > { %928 = vmatmul.mubr.msk.f32.vlgmr.msra.gmra.mxu0 %vm448_vm5, %v436_v62 }
 0x146   : > { %v446_v1 = vpop.permute.xlu1 %445 }
 0x14a   : > { %v666_v8 = vpop.permute.xlu1 %665 }
 0x14e   : > { %v634_v10 = vpop.permute.xlu1 %633 }
 0x205   : > { %v522_v2 = vpop.f32.mrf.mxu0 }
 0x206   : > { %v523_v3 = vadd.f32 %v522_v2, %v446_v1 }
 0x207   : > { %v929_v4 = vpop.f32.mrf.mxu0 }
 0x208   : > { %v526_v5 = vmax.f32 %v523_v3, 0.0 }
 0x20a   : > { %530 = vrot.lane.b32.xlu0 %v526_v5, %s1120_s17  ;;  %s1483_s17 = smov 118  }
 0x20e   : > { %649 = vrot.lane.b32.xlu0 %v1290_v6, %s1119_s11  ;;  %s1482_s11 = smov 110  }
 0x212   : > { %617 = vrot.lane.b32.xlu0 %v1301_v14, %s1121_s12  ;;  %s1484_s12 = smov 112  }
 0x216   : > { %585 = vrot.lane.b32.xlu0 %v1314_v16, %s1123_s20  ;;  %v602_v16 = vpop.permute.xlu1 %601  ;;  %s1485_s20 = smov 119  }
 0x21a   : > { %553 = vrot.lane.b32.xlu0 %v1337_v19, %s1125_s13  ;;  %v570_v22 = vpop.permute.xlu1 %569 }
 0x27c   : > { %v531_v7 = vpop.permute.xlu0 %530 }
 0x27d   : > { %534 = vst.msk [vmem:[#allocation4] sm:$0xff] %vm533_vm7, %v531_v7 }
 0x280   : > { %v650_v9 = vpop.permute.xlu0 %649 }
 0x284   : > { %v535_v11 = vld [vmem:[#allocation4] sm:$0xff]  ;;  %v618_v12 = vpop.permute.xlu0 %617 }
 0x285   : > { %v543_v6 = vmul.f32 %v1344_v24, %v535_v11  ;;  %v652_v13 = vmul.f32 %v650_v9, %v535_v11  ;;  %v668_v15 = vmul.f32 %v666_v8, %v535_v11  ;;  %v620_v17 = vmul.f32 %v618_v12, %v535_v11 }
 0x286   : > { %v636_v18 = vmul.f32 %v634_v10, %v535_v11  ;;  %v604_v20 = vmul.f32 %v602_v16, %v535_v11  ;;  %v572_v24 = vmul.f32 %v570_v22, %v535_v11 }
 0x287   : > { %654 = vrot.lane.b32.xlu0 %v652_v13, %s1128_s28  ;;  %545 = vst.msk [vmem:[#allocation5] sm:$0xff] %vm544_vm8, %v543_v6  ;;  %670 = vrot.lane.b32.xlu1 %v668_v15, %s1482_s11  ;;  %s858_s28 = sshll.u32 %s1269_s29, 3 }
 0x288   : > { %v586_v14 = vpop.permute.xlu0 %585  ;;  %s269_s18 = scalar_lea.vmem [#allocation9], %s858_s28 }
 0x289   : > { %v588_v19 = vmul.f32 %v586_v14, %v535_v11 }
 0x28b   : > { %622 = vrot.lane.b32.xlu0 %v620_v17, %s1483_s17  ;;  %638 = vrot.lane.b32.xlu1 %v636_v18, %s1484_s12  ;;  %s767_s17 = scalar_lea.sflag [#allocation8], %s1269_s29 }
 0x28c   : > { %v554_v21 = vpop.permute.xlu0 %553 }
 0x28d   : > { %v556_v23 = vmul.f32 %v554_v21, %v535_v11 }
 0x28e   : > { %v675_v43 = vld [vmem:[#allocation5] sm:$0xff] }
 0x28f   : > { %590 = vrot.lane.b32.xlu0 %v588_v19, %s1134_s7  ;;  %606 = vrot.lane.b32.xlu1 %v604_v20, %s1485_s20  ;;  %s897_s7 = sshll.u32 %s1193_s25, 7  ;;  %s1136_s20 = smov [#allocation9]  }
 0x290   : > { %s778_s11 = scalar_lea.hbm %s1469_s6, %s897_s7  ;;  %s1052_s25 = sshll.u32 %s1136_s20, 4  ;;  %s1053_s25 = int_to_ptr.vmem [resolvable:$false] %s1052_s25 }
 0x291   : > { %s1054_s26 = scalar_lea.vmem %s1053_s25, 256 }
 0x293   : > { %558 = vrot.lane.b32.xlu0 %v556_v23, %s1135_s15  ;;  %574 = vrot.lane.b32.xlu1 %v572_v24, %s1131_s8  ;;  %s780_s8 = sshll.u32 %s269_s18, 4  ;;  %s781_s8 = int_to_ptr.vmem [resolvable:$true] %s780_s8 }
 0x294   : > { %s1048_s12 = scalar_lea.vmem %s781_s8, 128  ;;  %p1055_p5 = scmp.lt.s32.totalorder %s781_s8, %s1053_s25 }
 0x295   : > { %p1049_p11 = scmp.ne.s32.totalorder %s781_s8, %s1048_s12  ;;  %p1056_p7 = scmp.lt.s32.totalorder %s1054_s26, %s1048_s12 }
 0x297   : > { %687 = vperm.xlu1 %1018, %v684_v25   ;;  %p1050_p13 = pnand %p1049_p11, %p1486_p12  ;;  %p1057_p8 = por %p1056_p7, %p1055_p5 }
 0x299   : > { %p1051_p4 = pneg %p1050_p13 }
 0x29b   : > { %p1058_p10 = pnand %p1057_p8, %p1051_p4 }
 0x2f9   : > { %v655_v26 = vpop.permute.xlu0 %654  ;;  %v671_v27 = vpop.permute.xlu1 %670 }
 0x2fa   : > { %657 = vst.msk [vmem:[#allocation5 + $0x38] sm:$0xff] %vm544_vm8, %v655_v26  ;;  %673 = vst.msk [vmem:[#allocation5 + $0x40] sm:$0xff] %vm544_vm8, %v671_v27 }
 0x2fd   : > { %v623_v28 = vpop.permute.xlu0 %622  ;;  %v639_v29 = vpop.permute.xlu1 %638 }
 0x2fe   : > { %625 = vst.msk [vmem:[#allocation5 + $0x28] sm:$0xff] %vm544_vm8, %v623_v28  ;;  %641 = vst.msk [vmem:[#allocation5 + $0x30] sm:$0xff] %vm544_vm8, %v639_v29 }
 0x301   : > { %v591_v30 = vpop.permute.xlu0 %590  ;;  %v607_v31 = vpop.permute.xlu1 %606  ;;  %v683_v32 = vld [vmem:[#allocation5 + $0x40] sm:$0xff]  ;;  %v682_v33 = vld [vmem:[#allocation5 + $0x38] sm:$0xff] }
 0x302   : > { %593 = vst.msk [vmem:[#allocation5 + $0x18] sm:$0xff] %vm544_vm8, %v591_v30  ;;  %609 = vst.msk [vmem:[#allocation5 + $0x20] sm:$0xff] %vm544_vm8, %v607_v31  ;;  %931 = vmatpush3.msra.mxu1 %v683_v32 }
 0x303   : > { %932 = vmatprep.subr.mxu1 %v1117_v0 }
 0x304   : > { %933 = vmatpush3.msra.mxu1 %v682_v33 }
 0x305   : > { %v559_v34 = vpop.permute.xlu0 %558  ;;  %v575_v35 = vpop.permute.xlu1 %574  ;;  %934 = vmatprep.subr.mxu1 %v1117_v0  ;;  %v681_v36 = vld [vmem:[#allocation5 + $0x30] sm:$0xff]  ;;  %v680_v37 = vld [vmem:[#allocation5 + $0x28] sm:$0xff] }
 0x306   : > { %561 = vst.msk [vmem:[#allocation5 + $0x8] sm:$0xff] %vm544_vm8, %v559_v34  ;;  %577 = vst.msk [vmem:[#allocation5 + $0x10] sm:$0xff] %vm544_vm8, %v575_v35  ;;  %935 = vmatpush3.msra.mxu1 %v681_v36 }
 0x307   : > { %936 = vmatprep.subr.mxu1 %v1117_v0 }
 0x308   : > { %937 = vmatpush3.msra.mxu1 %v680_v37 }
 0x309   : > { %938 = vmatprep.subr.mxu1 %v1117_v0  ;;  %v679_v38 = vld [vmem:[#allocation5 + $0x20] sm:$0xff]  ;;  %v678_v39 = vld [vmem:[#allocation5 + $0x18] sm:$0xff] }
 0x30a   : > { %939 = vmatpush3.msra.mxu1 %v679_v38 }
 0x30b   : > { %940 = vmatprep.subr.mxu1 %v1117_v0 }
 0x30c   : > { %941 = vmatpush3.msra.mxu1 %v678_v39 }
 0x30d   : > { %942 = vmatprep.subr.mxu1 %v1117_v0  ;;  %v677_v40 = vld [vmem:[#allocation5 + $0x10] sm:$0xff]  ;;  %v676_v41 = vld [vmem:[#allocation5 + $0x8] sm:$0xff] }
 0x30e   : > { %943 = vmatpush3.msra.mxu1 %v677_v40 }
 0x30f   : > { %944 = vmatprep.subr.mxu1 %v1117_v0 }
 0x310   : > { %945 = vmatpush3.msra.mxu1 %v676_v41 }
 0x311   : > { %946 = vmatprep.subr.mxu1 %v1117_v0 }
 0x312   : > { %947 = vmatpush3.msra.mxu1 %v675_v43  ;;  %v688_v44 = vpop.permute.xlu1 %687 }
 0x313   : > { %949 = vmatmul.mubr.msk.f32.vlgmr.msra.gmra.mxu1 %vm690_vm9, %v674_v42 }
 0x3d3   : > { %v760_v45 = vpop.f32.mrf.mxu1 }
 0x3d4   : > { %v761_v46 = vadd.f32 %v760_v45, %v688_v44 }
 0x3d5   : > { %v950_v47 = vpop.f32.mrf.mxu1 }
 0x3d6   : > { %v764_v48 = vmax.f32 %v761_v46, 0.0 }
 0x3d8   : > { %765 = vst.msk [vmem:[%s269_s18] sm:$0xff] %vm544_vm8, %v764_v48 }
 0x3d9   : > { %1061 = shalt.err (!%p1058_p10)
}
 0x3da   : > { %s1062_s13 = scalar_lea.hbm %s778_s11, 128  ;;  %s1066_s15 = scalar_lea.hbm %s1469_s6, 256 }
 0x3db   : > { %p1063_p0 = scmp.ne.s32.totalorder %s778_s11, %s1062_s13  ;;  %p1067_p1 = scmp.lt.s32.totalorder %s778_s11, %s1469_s6 }
 0x3dc   : > { %p1068_p3 = scmp.lt.s32.totalorder %s1066_s15, %s1062_s13 }
 0x3dd   : > { %p1064_p2 = pnand %p1063_p0, %p1486_p12 }
 0x3de   : > { %p1069_p6 = por %p1068_p3, %p1067_p1 }
 0x3df   : > { %p1065_p9 = pneg %p1064_p2 }
 0x3e1   : > { %p1070_p11 = pnand %p1069_p6, %p1065_p9 }
 0x3e3   : > { %1073 = shalt.err (!%p1070_p11)
}
 0x3e4   : > { %953 = dma.vmem_to_hbm [thread:$0]  (%p1486_p12), %s781_s8, 128, %s778_s11, %s767_s17  }
 0x3e5 PF: > { %s792_s18 = sand.u32 1, %s1100_s21   ;;  %p1487_p13 = scmp.ne.s32.totalorder %s1479_s10, 0 }
 0x3e6   : > { %p1488_p4 = scmp.ge.s32.totalorder %s1112_s24, 2  ;;  %s793_s19 = scalar_lea.sflag [#allocation8], %s792_s18 }
 0x3e8   : > { %p960_p5 = pnand %p1488_p4, %p1487_p13 }
 0x3ea   : > { %p961_p7 = pneg %p960_p5 }
 0x3ec   : > { %1095 = dma.done.wait (%p961_p7), %s793_s19, 128  }
 0x3ed   : > { %1097 = vsyncadd (%p961_p7), %s793_s19, 4294967168  ;;  %p19_p8 = scmp.ge.s32.totalorder %s1197_s27, 4   ;;  %s1489_s21 = smov %s1104_s22 }
 0x3ee   : > { %s1490_s22 = smov %s1108_s23  ;;  %s1491_s23 = smov %s1209_s30 }
 0x3ef   : > { %s1492_s24 = smov %s1197_s27  ;;  %21 = sbr.rel (!%p19_p8) target bundleno = 5 (0x5), region = 97 }
 0x3f4   :  { %798 = vsyncpa [#allocation7], 1 }
 0x3f5   :  { %800 = vsyncpa [#allocation7 + $0x1], 1 }
 0x3f6   :  { %801 = vsyncpa [#allocation8], 1 }
 0x3f7   :  { %803 = vsyncpa [#allocation8 + $0x1], 1 }

</bundles_post_ra>
